<compile_context>
chip_gen: v5e
topology: v5e:2x2
jax: 0.10.0
libtpu: 0.0.40
codegen_flags: <defaults>
</compile_context>

<pallas_src>
import functools

import jax
import jax.numpy as jnp
from jax.experimental import pallas as pl
from jax.experimental.pallas import tpu as pltpu


def transition_kernel(x_ref, params_ref, w_ref, o_ref, *, compute_dtype):
    # x_ref:      (1, 2, 2, Cin, Tp) bf16  -- 2x2 pool-window offsets (dh, dw) as leading dims,
    #                                         channels on sublanes, pooled pixels on lanes
    # params_ref: (2, Cin, 1) f32          -- [0] = gamma/sqrt(var+eps), [1] = beta - mean*scale
    # w_ref:      (Cout, Cin) bf16         -- 1x1 conv weight, 0.25 pool factor folded in
    # o_ref:      (1, Cout, Tp) bf16       -- NCHW-layout output tile (lane-dense along Tp)
    cin = x_ref.shape[3]
    tp = x_ref.shape[4]

    scale = params_ref[0].astype(compute_dtype)            # (Cin, 1)
    shift = params_ref[1].astype(compute_dtype)            # (Cin, 1)

    # Collapse the 2x2 window offsets into one leading dim (layout-free reshape of
    # leading dims) so BN + ReLU is one broadcasted multiply/add/max, not four.
    x = x_ref[0].reshape(4, cin, tp).astype(compute_dtype)             # (4, Cin, Tp)
    act = jnp.maximum(x * scale[None] + shift[None], 0)                # BN + ReLU

    # 2x2 sum-pool: 3 VPU adds across the leading dim (no pooling matmul).
    pooled = act[0] + act[1] + act[2] + act[3]                         # (Cin, Tp)

    # 1x1 conv: bf16 MXU matmul with f32 accumulation; 0.25 already folded into w.
    # Contraction over Cin -> (Cout, Tp) lands directly in NCHW layout.
    o_ref[0] = jnp.dot(w_ref[...], pooled.astype(jnp.bfloat16),
                       preferred_element_type=jnp.float32).astype(o_ref.dtype)


def _device_kind():
    try:
        return jax.devices()[0].device_kind.lower()
    except Exception:
        return ""


def _elementwise_dtype():
    kind = _device_kind()
    if "v6" in kind or "v7" in kind:
        return jnp.bfloat16          # v6e / v7x: bf16 VALUs -> keep elementwise math packed
    return jnp.float32               # v5e and older: no bf16 VALU


def _vmem_budget_bytes():
    kind = _device_kind()
    if any(v in kind for v in ("v2", "v3", "v4", "v5")):
        return 8 << 20               # 16 MiB scoped-VMEM default -> use half
    return 14 << 20                  # v6e/v7x: 32 MiB scoped default -> leave headroom


def _pick_spatial_tile(hwo, cin, cout):
    """Lane-dense (multiple-of-128) pooled-pixel tile sized to the per-generation
    VMEM budget; never falls back to an unbounded full-extent tile."""
    budget = _vmem_budget_bytes()
    # Per-step VMEM estimate:
    #   input block, double buffered: 2 * (4 * Tp * Cin) * 2B
    #   BN/pool temporaries:          ~Tp * Cin * 4B
    #   output block, double buffered: 2 * Cout * Tp * 2B
    per_tp = 16 * cin + 4 * cin + 4 * cout
    tp = budget // max(per_tp, 1)
    tp = max(128, (tp // 128) * 128)
    tp = min(tp, 2048)               # amortization flattens out; keep the pipeline deep
    if hwo <= tp:
        return hwo                   # full extent (always layout-legal)
    return tp


def transition_forward(x_nchw, gamma, beta, running_mean, running_var, conv_w, eps=1e-5):
    N, Cin, H, W = x_nchw.shape
    Cout = conv_w.shape[0]
    assert H % 2 == 0 and W % 2 == 0, "avg_pool2d(2) path assumes even H, W"
    Ho, Wo = H // 2, W // 2
    HWo = Ho * Wo

    # --- parameter glue (plain JAX, trace time) ---
    scale = (gamma / jnp.sqrt(running_var + eps)).astype(jnp.float32)              # (Cin,)
    shift = (beta.astype(jnp.float32) - running_mean.astype(jnp.float32) * scale)  # (Cin,)
    params = jnp.stack([scale, shift]).reshape(2, Cin, 1)                          # (2, Cin, 1) f32
    # 1x1 conv weight with the 2x2 average-pool 1/4 folded in; bf16 for the MXU.
    w = (conv_w.reshape(Cout, Cin).astype(jnp.float32) * 0.25).astype(jnp.bfloat16)

    # NCHW -> (N, 2, 2, Cin, Ho*Wo): pool-window offsets become leading dims, channels on
    # sublanes, pooled pixels lane-dense in the last dim. Single XLA pass over x.
    x = (x_nchw.reshape(N, Cin, Ho, 2, Wo, 2)
               .transpose(0, 3, 5, 1, 2, 4)            # (N, dh, dw, Cin, Ho, Wo)
               .reshape(N, 2, 2, Cin, HWo)
               .astype(jnp.bfloat16))

    compute_dtype = _elementwise_dtype()
    Tp = _pick_spatial_tile(HWo, Cin, Cout)
    grid = (N, pl.cdiv(HWo, Tp))

    out = pl.pallas_call(
        functools.partial(transition_kernel, compute_dtype=compute_dtype),
        out_shape=jax.ShapeDtypeStruct((N, Cout, HWo), jnp.bfloat16),
        grid_spec=pltpu.PrefetchScalarGridSpec(
            num_scalar_prefetch=0,
            grid=grid,
            in_specs=[
                pl.BlockSpec((1, 2, 2, Cin, Tp), lambda n, p: (n, 0, 0, 0, p)),
                pl.BlockSpec((2, Cin, 1), lambda n, p: (0, 0, 0)),
                pl.BlockSpec((Cout, Cin), lambda n, p: (0, 0)),
            ],
            out_specs=pl.BlockSpec((1, Cout, Tp), lambda n, p: (n, 0, p)),
        ),
        compiler_params=pltpu.CompilerParams(
            dimension_semantics=("parallel", "parallel")),
    )(x, params, w)

    # (N, Cout, Ho*Wo) -> (N, Cout, Ho, Wo): metadata-only reshape, no data movement.
    return out.reshape(N, Cout, Ho, Wo)


def transition_reference(x, gamma, beta, rm, rv, w, eps=1e-5):
    # plain-JAX reference mirroring the PyTorch forward (eval-mode BN)
    xn = (x - rm[None, :, None, None]) / jnp.sqrt(rv[None, :, None, None] + eps)
    out0 = xn * gamma[None, :, None, None] + beta[None, :, None, None]
    out00 = jnp.maximum(out0, 0.0)
    out1 = jax.lax.conv_general_dilated(
        out00, w, window_strides=(1, 1), padding="VALID",
        dimension_numbers=("NCHW", "OIHW", "NCHW"))
    N, C, H, W = out1.shape
    return out1.reshape(N, C, H // 2, 2, W // 2, 2).mean(axis=(3, 5))


if __name__ == "__main__":
    key = jax.random.PRNGKey(0)
    N, in_planes, out_planes, H, W = 2, 4, 2, 16, 16

    k_x, k_w = jax.random.split(key)
    x = jax.random.normal(k_x, (N, in_planes, H, W), dtype=jnp.float32)

    # deterministic parameter init (synthetic; shapes match nn.BatchNorm2d / nn.Conv2d(1x1, bias=False))
    gamma = 1.0 + 0.1 * jnp.arange(in_planes, dtype=jnp.float32)
    beta = 0.05 * jnp.arange(in_planes, dtype=jnp.float32)
    running_mean = 0.02 * jnp.arange(in_planes, dtype=jnp.float32)
    running_var = 1.0 + 0.03 * jnp.arange(in_planes, dtype=jnp.float32)
    conv_w = 0.1 * jax.random.normal(k_w, (out_planes, in_planes, 1, 1), dtype=jnp.float32)

    out = transition_forward(x, gamma, beta, running_mean, running_var, conv_w)
    out = jax.block_until_ready(out)

    ref = transition_reference(x, gamma, beta, running_mean, running_var, conv_w)
    assert out.shape == (N, out_planes, H // 2, W // 2), out.shape
    out_f32 = out.astype(jnp.float32)
    max_err = float(jnp.max(jnp.abs(out_f32 - ref)))
    # bf16 activations + bf16 MXU matmul (f32 accumulation) + bf16 output
    # => relaxed tolerance vs the f32 reference.
    assert jnp.allclose(out_f32, ref, atol=5e-2, rtol=5e-2), max_err

    print("KERNEL_OK")
</pallas_src>

<mosaic_0001>
module attributes {stable_mosaic.version = 11 : i64} {
  func.func @transition_kernel(%arg0: i32, %arg1: i32, %arg2: memref<1x2x2x4x64xbf16, #tpu.memory_space<vmem>>, %arg3: memref<2x4x1xf32, #tpu.memory_space<vmem>>, %arg4: memref<2x4xbf16, #tpu.memory_space<vmem>>, %arg5: memref<1x2x64xbf16, #tpu.memory_space<vmem>>) attributes {dimension_semantics = [#tpu.dimension_semantics<parallel>, #tpu.dimension_semantics<parallel>], iteration_bounds = array<i64: 2, 1>, scalar_prefetch = 0 : i64, scratch_operands = 0 : i64, tpu.core_type = #tpu.core_type<tc>, window_params = [{transform_indices = @transform_0, window_bounds = array<i64: 1, 2, 2, 4, 64>}, {pipeline_mode = #tpu.pipeline_mode<synchronous>, transform_indices = @transform_1, window_bounds = array<i64: 2, 4, 1>}, {pipeline_mode = #tpu.pipeline_mode<synchronous>, transform_indices = @transform_2, window_bounds = array<i64: 2, 4>}, {transform_indices = @transform_3, window_bounds = array<i64: 1, 2, 64>}]} {
    %c0 = arith.constant 0 : index
    %c0_0 = arith.constant 0 : index
    %c0_1 = arith.constant 0 : index
    %0 = vector.load %arg3[%c0, %c0_0, %c0_1] : memref<2x4x1xf32, #tpu.memory_space<vmem>>, vector<1x4x1xf32>
    %1 = vector.shape_cast %0 : vector<1x4x1xf32> to vector<4x1xf32>
    %c1 = arith.constant 1 : index
    %c0_2 = arith.constant 0 : index
    %c0_3 = arith.constant 0 : index
    %2 = vector.load %arg3[%c1, %c0_2, %c0_3] : memref<2x4x1xf32, #tpu.memory_space<vmem>>, vector<1x4x1xf32>
    %3 = vector.shape_cast %2 : vector<1x4x1xf32> to vector<4x1xf32>
    %c0_4 = arith.constant 0 : index
    %c0_5 = arith.constant 0 : index
    %c0_6 = arith.constant 0 : index
    %c0_7 = arith.constant 0 : index
    %c0_8 = arith.constant 0 : index
    %4 = vector.load %arg2[%c0_4, %c0_5, %c0_6, %c0_7, %c0_8] : memref<1x2x2x4x64xbf16, #tpu.memory_space<vmem>>, vector<1x2x2x4x64xbf16>
    %5 = vector.shape_cast %4 : vector<1x2x2x4x64xbf16> to vector<2x2x4x64xbf16>
    %6 = vector.shape_cast %5 : vector<2x2x4x64xbf16> to vector<4x4x64xbf16>
    %7 = arith.extf %6 : vector<4x4x64xbf16> to vector<4x4x64xf32>
    %8 = vector.shape_cast %1 : vector<4x1xf32> to vector<1x4x1xf32>
    %9 = vector.broadcast %8 : vector<1x4x1xf32> to vector<4x4x64xf32>
    %10 = arith.mulf %7, %9 : vector<4x4x64xf32>
    %11 = vector.shape_cast %3 : vector<4x1xf32> to vector<1x4x1xf32>
    %12 = vector.broadcast %11 : vector<1x4x1xf32> to vector<4x4x64xf32>
    %13 = arith.addf %10, %12 : vector<4x4x64xf32>
    %cst = arith.constant 0.000000e+00 : f32
    %14 = vector.broadcast %cst : f32 to vector<4x4x64xf32>
    %15 = arith.maximumf %13, %14 : vector<4x4x64xf32>
    %16 = vector.extract_strided_slice %15 {offsets = [0, 0, 0], sizes = [1, 4, 64], strides = [1, 1, 1]} : vector<4x4x64xf32> to vector<1x4x64xf32>
    %17 = vector.shape_cast %16 : vector<1x4x64xf32> to vector<4x64xf32>
    %18 = vector.extract_strided_slice %15 {offsets = [1, 0, 0], sizes = [1, 4, 64], strides = [1, 1, 1]} : vector<4x4x64xf32> to vector<1x4x64xf32>
    %19 = vector.shape_cast %18 : vector<1x4x64xf32> to vector<4x64xf32>
    %20 = arith.addf %17, %19 : vector<4x64xf32>
    %21 = vector.extract_strided_slice %15 {offsets = [2, 0, 0], sizes = [1, 4, 64], strides = [1, 1, 1]} : vector<4x4x64xf32> to vector<1x4x64xf32>
    %22 = vector.shape_cast %21 : vector<1x4x64xf32> to vector<4x64xf32>
    %23 = arith.addf %20, %22 : vector<4x64xf32>
    %24 = vector.extract_strided_slice %15 {offsets = [3, 0, 0], sizes = [1, 4, 64], strides = [1, 1, 1]} : vector<4x4x64xf32> to vector<1x4x64xf32>
    %25 = vector.shape_cast %24 : vector<1x4x64xf32> to vector<4x64xf32>
    %26 = arith.addf %23, %25 : vector<4x64xf32>
    %c0_9 = arith.constant 0 : index
    %c0_10 = arith.constant 0 : index
    %27 = vector.load %arg4[%c0_9, %c0_10] : memref<2x4xbf16, #tpu.memory_space<vmem>>, vector<2x4xbf16>
    %28 = arith.truncf %26 : vector<4x64xf32> to vector<4x64xbf16>
    %cst_11 = arith.constant dense<0.000000e+00> : vector<2x64xf32>
    %29 = tpu.matmul %27, %28, %cst_11 {dimension_numbers = #tpu.dot_dimension_numbers<[1], [0], [0], [1], [0, 0, 1, 1], [], []>} : vector<2x4xbf16>, vector<4x64xbf16>, vector<2x64xf32> -> vector<2x64xf32>
    %30 = arith.truncf %29 : vector<2x64xf32> to vector<2x64xbf16>
    %c0_12 = arith.constant 0 : index
    %c0_13 = arith.constant 0 : index
    %c0_14 = arith.constant 0 : index
    %31 = vector.load %arg5[%c0_12, %c0_13, %c0_14] : memref<1x2x64xbf16, #tpu.memory_space<vmem>>, vector<1x2x64xbf16>
    %32 = vector.shape_cast %31 : vector<1x2x64xbf16> to vector<2x64xbf16>
    %33 = vector.shape_cast %30 : vector<2x64xbf16> to vector<1x2x64xbf16>
    tpu.vector_store %arg5[%c0_12, %c0_13, %c0_14], %33 {strides = array<i32>} : memref<1x2x64xbf16, #tpu.memory_space<vmem>>, vector<1x2x64xbf16>,
    return
  }
  func.func @transform_0(%arg0: i32, %arg1: i32) -> (i32, i32, i32, i32, i32) {
    %c0_i32 = arith.constant 0 : i32
    %c0_i32_0 = arith.constant 0 : i32
    %c0_i32_1 = arith.constant 0 : i32
    %c0_i32_2 = arith.constant 0 : i32
    return %arg0, %c0_i32, %c0_i32_0, %c0_i32_1, %arg1 : i32, i32, i32, i32, i32
  }
  func.func @transform_1(%arg0: i32, %arg1: i32) -> (i32, i32, i32) {
    %c0_i32 = arith.constant 0 : i32
    %c0_i32_0 = arith.constant 0 : i32
    %c0_i32_1 = arith.constant 0 : i32
    %c0_i32_2 = arith.constant 0 : i32
    return %c0_i32, %c0_i32_0, %c0_i32_1 : i32, i32, i32
  }
  func.func @transform_2(%arg0: i32, %arg1: i32) -> (i32, i32) {
    %c0_i32 = arith.constant 0 : i32
    %c0_i32_0 = arith.constant 0 : i32
    %c0_i32_1 = arith.constant 0 : i32
    return %c0_i32, %c0_i32_0 : i32, i32
  }
  func.func @transform_3(%arg0: i32, %arg1: i32) -> (i32, i32, i32) {
    %c0_i32 = arith.constant 0 : i32
    %c0_i32_0 = arith.constant 0 : i32
    return %arg0, %c0_i32, %arg1 : i32, i32, i32
  }
}

</mosaic_0001>

<bundles_post_ra>
// kernel: tpu_custom_call.1
= control target key start
LH: loop header
LB: loop body
LE: loop exit
PB: predicated region body
PF: predicated region fallthrough
CT: control target
= control target key end

     0   :  { %8 = vsyncpa [#allocation3], 0  ;;  %s708_s0 = inlined_call_operand.hbm [shape: bf16[2,2,2,4,64], index: 0, kind: input, shape index: {}]   ;;  %s709_s1 = inlined_call_operand.vmem [shape: f32[2,4,1], index: 1, kind: input, shape index: {}]   ;;  %s710_s2 = inlined_call_operand.vmem [shape: bf16[2,4], index: 2, kind: input, shape index: {}]   ;;  %s711_s3 = inlined_call_operand.hbm [shape: bf16[2,2,64], index: 3, kind: output, shape index: {}]  }
   0x1   :  { %10 = vsyncpa [#allocation3 + $0x1], 0 }
   0x2   :  { %11 = vsyncpa [#allocation4], 0 }
   0x3   :  { %13 = vsyncpa [#allocation4 + $0x1], 0  ;;  %s578_s12 = smov 0   ;;  %s580_s13 = smov 0  }
   0x4   :  { %s582_s14 = smov 0   ;;  %s584_s15 = smov 0  }
   0x5   :  { %s586_s16 = smov 0   ;;  %s588_s17 = smov 0  }
   0x6 LB: > { %s361_s18 = sadd.s32 4294967295, %s553_s17   ;;  %s362_s19 = sadd.s32 4294967294, %s553_s17   ;;  %s553_s17 = sphi %s588_s17, %s19_s17   ;;  %s549_s16 = sphi %s586_s16, %s720_s16   ;;  %s545_s15 = sphi %s584_s15, %s719_s15   ;;  %s541_s14 = sphi %s582_s14, %s718_s14   ;;  %s537_s13 = sphi %s580_s13, %s717_s13   ;;  %s533_s12 = sphi %s578_s12, %s716_s12  }
   0x7   : > { %s31_s20 = sadd.s32 1, %s549_s16  ;;  %s40_s21 = sadd.s32 1, %s541_s14 }
   0x8   : > { %p33_p0 = scmp.ge.s32.totalorder %s31_s20, 2  ;;  %p47_p1 = scmp.ne.s32.totalorder %s541_s14, %s537_s13 }
   0x9   : > { %p48_p2 = scmp.eq.s32.totalorder %s553_s17, 0  ;;  %p53_p3 = scmp.ne.s32.totalorder %s537_s13, %s533_s12 }
   0xa   : > { %s722_s20 = smov (%p33_p0, %s31_s20), 0  ;;  %p54_p5 = scmp.eq.s32.totalorder %s361_s18, 0 }
   0xb   : > { %p619_p4 = por %p48_p2, %p47_p1  ;;  %s35_s23 = ssub.s32 %s549_s16, %s722_s20 }
   0xc   : > { %p121_p6 = scmp.eq.s32.totalorder %s361_s18, 1  ;;  %p38_p7 = scmp.eq.s32.totalorder %s35_s23, 0 }
   0xd   : > { %p625_p8 = por %p54_p5, %p53_p3  ;;  %p127_p10 = scmp.eq.s32.totalorder %s362_s19, 1 }
   0xe   : > { %p629_p9 = por %p121_p6, %p47_p1  ;;  %p364_p12 = scmp.ge.s32.totalorder %s553_s17, 2 }
   0xf   : > { %s634_s26 = scalar_select %p38_p7, %s541_s14, %s40_s21  }
  0x10   : > { %p636_p11 = por %p127_p10, %p53_p3  ;;  %p387_p13 = scmp.lt.s32.totalorder %s553_s17, 2 }
  0x11   : > { %s153_s28 = sand.u32 1, %s541_s14   ;;  %s374_s30 = sshll.u32 %s549_s16, 3 }
  0x12   : > { %s365_s29 = sshll.u32 %s153_s28, 3  ;;  %s163_s6 = scalar_lea.hbm %s708_s0, %s374_s30 }
  0x13   : > { %s157_s7 = scalar_lea.vmem [#allocation2], %s365_s29  ;;  %s164_s9 = sshll.u32 %s163_s6, 4  ;;  %s165_s9 = int_to_ptr.hbm [resolvable:$true] %s164_s9 }
  0x14   : > { %s166_s8 = sshll.u32 %s157_s7, 4  ;;  %p380_p0 = pnand %p387_p13, %p619_p4  ;;  %s167_s8 = int_to_ptr.vmem [resolvable:$true] %s166_s8 }
  0x15   : > { %p368_p1 = scmp.ge.s32.totalorder %s553_s17, 1  ;;  %s154_s10 = scalar_lea.sflag [#allocation3], %s153_s28 }
  0x16   : > { %s555_s11 = smov 32   ;;  %s556_s18 = smov 2  }
  0x17   : > { %382 = dma.hbm_to_vmem [thread:$0]  (!%p380_p0), %s165_s9, 128, %s167_s8, %s154_s10, %s555_s11, %s555_s11, %s556_s18  }
  0x18   : > { %p174_p2 = scmp.lt.s32.totalorder %s553_s17, 3 }
  0x1a   : > { %p175_p3 = pnand %p368_p1, %p174_p2 }
  0x1b   : > { %s652_s19 = sand.u32 (!%p175_p3), 1, %s537_s13  }
  0x1c   : > { %178 = sbr.rel (%p175_p3) target bundleno = 309 (0x135), region = 32  ;;  %s369_s21 = sshll.u32 (!%p175_p3), %s652_s19, 3 }
  0x1d   : > { %s181_s23 = scalar_lea.sflag (!%p175_p3), [#allocation3], %s652_s19  ;;  %s184_s29 = scalar_lea.vmem (!%p175_p3), [#allocation2], %s369_s21 }
  0x21   : > { %524 = dma.done.wait (%p625_p8), %s181_s23, 128  }
  0x22   : > { %526 = vsyncadd (%p625_p8), %s181_s23, 4294967168  ;;  %v557_v0 = vmov 0   ;;  %v208_v1 = vld [vmem:[%s709_s1] sm:$0xf]  ;;  %v370_v2 = vld [vmem:[%s709_s1 + $0x4] sm:$0xf]  ;;  %s280_s8 = scalar_lea.hbm %s711_s3, %s545_s15 }
  0x23   : > { %440 = vset.pattern.permute.xlu0 %v557_v0  ;;  %v211_v4 = vld [vmem:[%s184_s29] sm:$0x3]  ;;  %v212_v5 = vld [vmem:[%s184_s29 + $0x2] sm:$0x3]  ;;  %v213_v6 = vld [vmem:[%s184_s29 + $0x4] sm:$0x3] }
  0x24   : > { %221 = vperm.xlu0 %440, %v208_v1   ;;  %v214_v7 = vld [vmem:[%s184_s29 + $0x6] sm:$0x3]  ;;  %v215_v8 = vunpack.c.l.bf16 %v211_v4  ;;  %v216_v9 = vunpack.c.l.bf16 %v212_v5  ;;  %v217_v10 = vunpack.c.l.bf16 %v213_v6  ;;  %vm250_vm0 = vcmask 1041408   ;;  %v244_v30 = vld [vmem:[%s710_s2] sm:$0x1]  ;;  %s206_s9 = scalar_lea.vmem [#allocation5], %s652_s19 }
  0x25   : > { %v218_v11 = vunpack.c.l.bf16 %v214_v7  ;;  %vm246_vm1 = vcmask 31744   ;;  %s282_s10 = sshll.u32 %s206_s9, 4  ;;  %s284_s11 = sshll.u32 %s280_s8, 4  ;;  %vm268_vm2 = vcmask 516096   ;;  %s283_s10 = int_to_ptr.vmem [resolvable:$true] %s282_s10  ;;  %s285_s11 = int_to_ptr.hbm [resolvable:$true] %s284_s11 }
  0x26   : > { %s271_s18 = scalar_lea.sflag [#allocation4], %s652_s19  ;;  %s485_s21 = sshra.s32 %s285_s11, 4  ;;  %s486_s21 = int_to_ptr.hbm [resolvable:$true] %s485_s21 }
  0x27   : > { %s487_s23 = scalar_lea.hbm %s486_s21, 1  ;;  %s491_s15 = scalar_lea.hbm %s711_s3, 2 }
  0x28   : > { %p488_p4 = scmp.ne.s32.totalorder %s486_s21, %s487_s23  ;;  %p492_p7 = scmp.lt.s32.totalorder %s486_s21, %s711_s3 }
  0x29   : > { %p493_p8 = scmp.lt.s32.totalorder %s491_s15, %s487_s23 }
  0x2a   : > { %p489_p5 = pnand %p488_p4, %p629_p9 }
  0x2b   : > { %p494_p10 = por %p493_p8, %p492_p7 }
  0x2c   : > { %230 = vperm.xlu0 %440, %v370_v2   ;;  %p490_p6 = pneg %p489_p5 }
  0x2e   : > { %p495_p13 = pnand %p494_p10, %p490_p6 }
  0x96   : > { %v222_v3 = vpop.permute.xlu0 %221 }
  0x97   : > { %v224_v12 = vmul.f32 %v222_v3, %v215_v8  ;;  %v225_v13 = vmul.f32 %v222_v3, %v216_v9  ;;  %v226_v14 = vmul.f32 %v222_v3, %v217_v10  ;;  %v227_v16 = vmul.f32 %v222_v3, %v218_v11 }
  0x9e   : > { %v231_v15 = vpop.permute.xlu0 %230 }
  0x9f   : > { %v233_v17 = vadd.f32 %v231_v15, %v224_v12  ;;  %v234_v18 = vadd.f32 %v231_v15, %v225_v13  ;;  %v235_v19 = vadd.f32 %v231_v15, %v226_v14  ;;  %v236_v20 = vadd.f32 %v231_v15, %v227_v16 }
  0xa1   : > { %v237_v21 = vmax.f32 %v233_v17, 0.0  ;;  %v238_v22 = vmax.f32 %v234_v18, 0.0  ;;  %v239_v23 = vmax.f32 %v235_v19, 0.0  ;;  %v240_v25 = vmax.f32 %v236_v20, 0.0 }
  0xa3   : > { %v241_v24 = vadd.f32 %v238_v22, %v237_v21 }
  0xa5   : > { %v242_v26 = vadd.f32 %v241_v24, %v239_v23 }
  0xa7   : > { %v243_v27 = vadd.f32 %v242_v26, %v240_v25 }
  0xa9   : > { %v245_v28 = vpack.c.bf16 %v243_v27, %v243_v27 }
  0xab   : > { %v252_v29 = vsel %vm250_vm0, %v245_v28, 0 }
  0xac   : > { %261 = vmatpush.bf16.msra.mxu0 %v252_v29 }
  0xaf   : > { %371 = vmatmul.msk.bf16.vlgmr.msra.gmra.mxu0 %vm246_vm1, %v244_v30 }
 0x12c   : > { %v263_v31 = vpop.f32.mrf.mxu0 }
 0x12d   : > { %v267_v32 = vpack.c.bf16 %v263_v31, %v263_v31 }
 0x12f   : > { %269 = vst.msk [vmem:[%s206_s9] sm:$0x1] %vm268_vm2, %v267_v32 }
 0x130   : > { %498 = shalt.err (!%p495_p13)
}
 0x131   : > { %377 = dma.vmem_to_hbm [thread:$0]  (%p629_p9), %s283_s10, 16, %s285_s11, %s271_s18  }
 0x134   : > { %v265_v33 = vpop.f32.mrf.mxu0 }
 0x135 PF: > { %s296_s19 = sand.u32 1, %s533_s12   ;;  %p384_p0 = pnand %p364_p12, %p636_p11 }
 0x136   : > { %s297_s4 = scalar_lea.sflag [#allocation4], %s296_s19 }
 0x137   : > { %p385_p1 = pneg %p384_p0 }
 0x139   : > { %528 = dma.done.wait (%p385_p1), %s297_s4, 16  }
 0x13a   : > { %530 = vsyncadd (%p385_p1), %s297_s4, 4294967280  ;;  %s19_s17 = sadd.s32 1, %s553_s17   ;;  %s716_s12 = smov %s537_s13 }
 0x13b   : > { %p16_p2 = scmp.ge.s32.totalorder %s19_s17, 4   ;;  %s717_s13 = smov %s541_s14 }
 0x13c   : > { %s718_s14 = smov %s634_s26  ;;  %s719_s15 = smov %s549_s16 }
 0x13d   : > { %s720_s16 = smov %s722_s20  ;;  %18 = sbr.rel (!%p16_p2) target bundleno = 6 (0x6), region = 78 }
 0x142   :  { %302 = vsyncpa [#allocation3], 1 }
 0x143   :  { %304 = vsyncpa [#allocation3 + $0x1], 1 }
 0x144   :  { %305 = vsyncpa [#allocation4], 1 }
 0x145   :  { %307 = vsyncpa [#allocation4 + $0x1], 1 }

</bundles_post_ra>
